<compile_context>
chip_gen: v6e
topology: v6e:2x2x1
jax: 0.10.0
libtpu: 0.0.40
codegen_flags: <defaults>
</compile_context>

<pallas_src>
from functools import partial

import jax
import jax.numpy as jnp
from jax.experimental import pallas as pl
from jax.experimental.pallas import tpu as pltpu


LANE = 128


def _round_up(a: int, b: int) -> int:
    return ((a + b - 1) // b) * b


def node_model_kernel(x_ref, dst_ref, ea_ref,
                      w1x_ref, w1e_ref, b1_ref, w2_ref, b2_ref,
                      out_ref, acc_ref, *, count_col):
    e = pl.program_id(1)
    n_e = pl.num_programs(1)
    tN = acc_ref.shape[0]
    tE = ea_ref.shape[0]

    # --- init accumulator once per N tile ---
    @pl.when(e == 0)
    def _():
        acc_ref[...] = jnp.zeros_like(acc_ref)

    # --- scatter-sum (and count) via per-tile one-hot matmul on the MXU ---
    row0 = pl.program_id(0) * tN
    node_ids = row0 + jax.lax.broadcasted_iota(jnp.int32, (tN, tE), 0)   # [tN, tE]
    dst = dst_ref[...]                                                    # [1, tE] int32
    onehot = (node_ids == dst).astype(ea_ref.dtype)                       # [tN, tE]
    # edge_attr tile carries a ones column at `count_col`, so this single matmul
    # accumulates both the feature sums and the per-node edge counts.
    acc_ref[...] += jnp.dot(onehot, ea_ref[...],
                            preferred_element_type=jnp.float32)           # [tN, F_e_pad]

    # --- finalize: mean + node MLP, once per N tile ---
    @pl.when(e == n_e - 1)
    def _():
        acc = acc_ref[...]
        count = acc[:, count_col:count_col + 1]                           # [tN, 1]
        inv = pl.reciprocal(jnp.maximum(count, 1.0), approx=True)         # EUP slot
        agg = acc * inv                                                   # mean; 0 for empty nodes

        h = (jnp.dot(x_ref[...], w1x_ref[...], preferred_element_type=jnp.float32)
             + jnp.dot(agg, w1e_ref[...], preferred_element_type=jnp.float32)
             + b1_ref[...])
        h = jnp.maximum(h, 0.0)
        out = jnp.dot(h, w2_ref[...], preferred_element_type=jnp.float32) + b2_ref[...]
        out_ref[...] = out.astype(out_ref.dtype)


def node_model(x, edge_index, edge_attr, params, *, tile_n=128, tile_e=256):
    """x:[N,F_x] f32, edge_index:[2,E] int32, edge_attr:[E,F_e] f32 -> [N,F_out] f32."""
    N, F_x = x.shape
    E, F_e = edge_attr.shape
    w1x, w1e, b1, w2, b2 = (params["w1x"], params["w1e"], params["b1"],
                            params["w2"], params["b2"])
    H = w1x.shape[1]
    F_out = w2.shape[1]

    # Lane-padded feature dims (128-multiples); +1 column on F_e for the count.
    F_x_p = _round_up(F_x, LANE)
    F_e_p = _round_up(F_e + 1, LANE)
    H_p = _round_up(H, LANE)
    F_out_p = _round_up(F_out, LANE)

    # Tile sizes: tile_n/tile_e are 8/128-aligned; shrink to problem size when small.
    tN = min(tile_n, _round_up(N, 8))
    tE = min(tile_e, _round_up(E, 8))
    N_p = _round_up(N, tN)
    E_p = _round_up(E, tE)

    # Pad node features.
    x_p = jnp.zeros((N_p, F_x_p), jnp.float32).at[:N, :F_x].set(x)

    # Pad edge features; real edges get a 1.0 count column, padded edges are all
    # zero with dst = -1 so they never match any node.
    ea_p = jnp.zeros((E_p, F_e_p), jnp.float32)
    ea_p = ea_p.at[:E, :F_e].set(edge_attr)
    ea_p = ea_p.at[:E, F_e].set(1.0)
    dst_p = jnp.full((1, E_p), -1, jnp.int32)
    dst_p = dst_p.at[0, :E].set(edge_index[1].astype(jnp.int32))

    # Zero-padded weights/biases: pad lanes (incl. the count column) never leak.
    w1x_p = jnp.zeros((F_x_p, H_p), jnp.float32).at[:F_x, :H].set(w1x)
    w1e_p = jnp.zeros((F_e_p, H_p), jnp.float32).at[:F_e, :H].set(w1e)
    b1_p = jnp.zeros((1, H_p), jnp.float32).at[:, :H].set(b1)
    w2_p = jnp.zeros((H_p, F_out_p), jnp.float32).at[:H, :F_out].set(w2)
    b2_p = jnp.zeros((1, F_out_p), jnp.float32).at[:, :F_out].set(b2)

    grid = (N_p // tN, E_p // tE)   # (node tiles: parallel, edge tiles: reduction)

    out_p = pl.pallas_call(
        partial(node_model_kernel, count_col=F_e),
        out_shape=jax.ShapeDtypeStruct((N_p, F_out_p), jnp.float32),
        grid_spec=pltpu.PrefetchScalarGridSpec(
            num_scalar_prefetch=0,
            grid=grid,
            in_specs=[
                pl.BlockSpec((tN, F_x_p), lambda i, e: (i, 0)),        # x (resident over e)
                pl.BlockSpec((1, tE), lambda i, e: (0, e)),            # dst ids
                pl.BlockSpec((tE, F_e_p), lambda i, e: (e, 0)),        # edge_attr (+count col)
                pl.BlockSpec((F_x_p, H_p), lambda i, e: (0, 0)),       # w1x
                pl.BlockSpec((F_e_p, H_p), lambda i, e: (0, 0)),       # w1e
                pl.BlockSpec((1, H_p), lambda i, e: (0, 0)),           # b1
                pl.BlockSpec((H_p, F_out_p), lambda i, e: (0, 0)),     # w2
                pl.BlockSpec((1, F_out_p), lambda i, e: (0, 0)),       # b2
            ],
            out_specs=pl.BlockSpec((tN, F_out_p), lambda i, e: (i, 0)),
            scratch_shapes=[pltpu.VMEM((tN, F_e_p), jnp.float32)],     # agg_sum + count acc
        ),
        compiler_params=pltpu.CompilerParams(
            dimension_semantics=("parallel", "arbitrary")),
    )(x_p, dst_p, ea_p, w1x_p, w1e_p, b1_p, w2_p, b2_p)

    return out_p[:N, :F_out]


def make_params(key, f_x, f_e, hidden, f_out):
    """MLP params: Linear(f_x+f_e, hidden) -> ReLU -> Linear(hidden, f_out)."""
    k1, k2, k3, k4 = jax.random.split(key, 4)
    scale1 = 1.0 / jnp.sqrt(f_x + f_e)
    scale2 = 1.0 / jnp.sqrt(hidden)
    w1 = jax.random.uniform(k1, (f_x + f_e, hidden), jnp.float32, -scale1, scale1)
    b1 = jax.random.uniform(k2, (1, hidden), jnp.float32, -scale1, scale1)
    w2 = jax.random.uniform(k3, (hidden, f_out), jnp.float32, -scale2, scale2)
    b2 = jax.random.uniform(k4, (1, f_out), jnp.float32, -scale2, scale2)
    return {
        "w1x": w1[:f_x],       # first block of W1 (applied to x)
        "w1e": w1[f_x:],       # second block of W1 (applied to aggregated edges)
        "b1": b1,
        "w2": w2,
        "b2": b2,
    }


def reference(x, edge_index, edge_attr, params):
    """Pure-JAX reference (mirrors PyTorch scatter-mean + MLP)."""
    N = x.shape[0]
    dst = edge_index[1]
    agg_sum = jnp.zeros((N, edge_attr.shape[1]), jnp.float32).at[dst].add(edge_attr)
    count = jnp.zeros((N, 1), jnp.float32).at[dst].add(1.0)
    agg = agg_sum / jnp.maximum(count, 1.0)
    h = x @ params["w1x"] + agg @ params["w1e"] + params["b1"]
    h = jnp.maximum(h, 0.0)
    return h @ params["w2"] + params["b2"]


if __name__ == "__main__":
    key = jax.random.PRNGKey(0)
    k_x, k_ei, k_ea, k_p = jax.random.split(key, 4)

    # Small graph, chosen so the grid has multiple N tiles (parallel) and
    # multiple E tiles (reduction), plus non-multiple sizes to exercise padding.
    N, E = 100, 300
    F_x, F_e = 16, 16
    hidden, F_out = 32, 16

    x = jax.random.normal(k_x, (N, F_x), jnp.float32)
    edge_index = jax.random.randint(k_ei, (2, E), 0, N, jnp.int32)
    edge_attr = jax.random.normal(k_ea, (E, F_e), jnp.float32)
    params = make_params(k_p, F_x, F_e, hidden, F_out)

    out = node_model(x, edge_index, edge_attr, params, tile_n=64, tile_e=128)
    jax.block_until_ready(out)

    ref = reference(x, edge_index, edge_attr, params)
    assert out.shape == (N, F_out)
    # approx-reciprocal (EUP) introduces ~1e-3 relative error in the mean step.
    assert jnp.allclose(out, ref, atol=5e-3, rtol=5e-3), float(jnp.max(jnp.abs(out - ref)))

    print("KERNEL_OK")
</pallas_src>

<mosaic_0001>
module attributes {stable_mosaic.version = 11 : i64} {
  func.func @node_model_kernel(%arg0: i32, %arg1: i32, %arg2: memref<64x128xf32, #tpu.memory_space<vmem>>, %arg3: memref<1x128xi32, #tpu.memory_space<vmem>>, %arg4: memref<128x128xf32, #tpu.memory_space<vmem>>, %arg5: memref<128x128xf32, #tpu.memory_space<vmem>>, %arg6: memref<128x128xf32, #tpu.memory_space<vmem>>, %arg7: memref<1x128xf32, #tpu.memory_space<vmem>>, %arg8: memref<128x128xf32, #tpu.memory_space<vmem>>, %arg9: memref<1x128xf32, #tpu.memory_space<vmem>>, %arg10: memref<64x128xf32, #tpu.memory_space<vmem>>, %arg11: memref<64x128xf32, #tpu.memory_space<vmem>>) attributes {dimension_semantics = [#tpu.dimension_semantics<parallel>, #tpu.dimension_semantics<arbitrary>], iteration_bounds = array<i64: 2, 3>, scalar_prefetch = 0 : i64, scratch_operands = 1 : i64, tpu.core_type = #tpu.core_type<tc>, window_params = [{transform_indices = @transform_0, window_bounds = array<i64: 64, 128>}, {transform_indices = @transform_1, window_bounds = array<i64: 1, 128>}, {transform_indices = @transform_2, window_bounds = array<i64: 128, 128>}, {pipeline_mode = #tpu.pipeline_mode<synchronous>, transform_indices = @transform_3, window_bounds = array<i64: 128, 128>}, {pipeline_mode = #tpu.pipeline_mode<synchronous>, transform_indices = @transform_4, window_bounds = array<i64: 128, 128>}, {pipeline_mode = #tpu.pipeline_mode<synchronous>, transform_indices = @transform_5, window_bounds = array<i64: 1, 128>}, {pipeline_mode = #tpu.pipeline_mode<synchronous>, transform_indices = @transform_6, window_bounds = array<i64: 128, 128>}, {pipeline_mode = #tpu.pipeline_mode<synchronous>, transform_indices = @transform_7, window_bounds = array<i64: 1, 128>}, {transform_indices = @transform_8, window_bounds = array<i64: 64, 128>}]} {
    %c0_i32 = arith.constant 0 : i32
    %0 = arith.cmpi eq, %arg1, %c0_i32 : i32
    %1 = arith.extui %0 : i1 to i32
    %c0_i32_0 = arith.constant 0 : i32
    %2 = arith.cmpi ne, %1, %c0_i32_0 : i32
    scf.if %2 {
      %cst_9 = arith.constant 0.000000e+00 : f32
      %20 = vector.broadcast %cst_9 : f32 to vector<64x128xf32>
      %c0_10 = arith.constant 0 : index
      %c0_11 = arith.constant 0 : index
      %21 = vector.load %arg11[%c0_10, %c0_11] : memref<64x128xf32, #tpu.memory_space<vmem>>, vector<64x128xf32>
      tpu.vector_store %arg11[%c0_10, %c0_11], %20 {strides = array<i32>} : memref<64x128xf32, #tpu.memory_space<vmem>>, vector<64x128xf32>,
    } else {
    }
    %c64_i32 = arith.constant 64 : i32
    %3 = arith.muli %arg0, %c64_i32 : i32
    %4 = tpu.iota {dimensions = array<i32: 0>} : vector<64x128xi32>
    %5 = vector.broadcast %3 : i32 to vector<64x128xi32>
    %6 = arith.addi %5, %4 : vector<64x128xi32>
    %c0 = arith.constant 0 : index
    %c0_1 = arith.constant 0 : index
    %7 = vector.load %arg3[%c0, %c0_1] : memref<1x128xi32, #tpu.memory_space<vmem>>, vector<1x128xi32>
    %8 = vector.broadcast %7 : vector<1x128xi32> to vector<64x128xi32>
    %9 = arith.cmpi eq, %6, %8 : vector<64x128xi32>
    %10 = arith.extui %9 : vector<64x128xi1> to vector<64x128xi32>
    %11 = arith.sitofp %10 : vector<64x128xi32> to vector<64x128xf32>
    %c0_2 = arith.constant 0 : index
    %c0_3 = arith.constant 0 : index
    %12 = vector.load %arg11[%c0_2, %c0_3] : memref<64x128xf32, #tpu.memory_space<vmem>>, vector<64x128xf32>
    %c0_4 = arith.constant 0 : index
    %c0_5 = arith.constant 0 : index
    %13 = vector.load %arg4[%c0_4, %c0_5] : memref<128x128xf32, #tpu.memory_space<vmem>>, vector<128x128xf32>
    %cst = arith.constant dense<0.000000e+00> : vector<64x128xf32>
    %14 = tpu.matmul %11, %13, %cst {dimension_numbers = #tpu.dot_dimension_numbers<[1], [0], [0], [1], [0, 0, 1, 1], [], []>} : vector<64x128xf32>, vector<128x128xf32>, vector<64x128xf32> -> vector<64x128xf32>
    %15 = arith.addf %12, %14 : vector<64x128xf32>
    %c0_6 = arith.constant 0 : index
    %c0_7 = arith.constant 0 : index
    %16 = vector.load %arg11[%c0_6, %c0_7] : memref<64x128xf32, #tpu.memory_space<vmem>>, vector<64x128xf32>
    tpu.vector_store %arg11[%c0_6, %c0_7], %15 {strides = array<i32>} : memref<64x128xf32, #tpu.memory_space<vmem>>, vector<64x128xf32>,
    %c2_i32 = arith.constant 2 : i32
    %17 = arith.cmpi eq, %arg1, %c2_i32 : i32
    %18 = arith.extui %17 : i1 to i32
    %c0_i32_8 = arith.constant 0 : i32
    %19 = arith.cmpi ne, %18, %c0_i32_8 : i32
    scf.if %19 {
      %c0_9 = arith.constant 0 : index
      %c0_10 = arith.constant 0 : index
      %20 = vector.load %arg11[%c0_9, %c0_10] : memref<64x128xf32, #tpu.memory_space<vmem>>, vector<64x128xf32>
      %21 = vector.extract_strided_slice %20 {offsets = [0, 16], sizes = [64, 1], strides = [1, 1]} : vector<64x128xf32> to vector<64x1xf32>
      %cst_11 = arith.constant 1.000000e+00 : f32
      %22 = vector.broadcast %cst_11 : f32 to vector<64x1xf32>
      %23 = arith.maximumf %21, %22 : vector<64x1xf32>
      %24 = tpu.reciprocal %23 {approx = true} : vector<64x1xf32> -> vector<64x1xf32>
      %25 = vector.broadcast %24 : vector<64x1xf32> to vector<64x128xf32>
      %26 = arith.mulf %20, %25 : vector<64x128xf32>
      %c0_12 = arith.constant 0 : index
      %c0_13 = arith.constant 0 : index
      %27 = vector.load %arg2[%c0_12, %c0_13] : memref<64x128xf32, #tpu.memory_space<vmem>>, vector<64x128xf32>
      %c0_14 = arith.constant 0 : index
      %c0_15 = arith.constant 0 : index
      %28 = vector.load %arg5[%c0_14, %c0_15] : memref<128x128xf32, #tpu.memory_space<vmem>>, vector<128x128xf32>
      %cst_16 = arith.constant dense<0.000000e+00> : vector<64x128xf32>
      %29 = tpu.matmul %27, %28, %cst_16 {dimension_numbers = #tpu.dot_dimension_numbers<[1], [0], [0], [1], [0, 0, 1, 1], [], []>} : vector<64x128xf32>, vector<128x128xf32>, vector<64x128xf32> -> vector<64x128xf32>
      %c0_17 = arith.constant 0 : index
      %c0_18 = arith.constant 0 : index
      %30 = vector.load %arg6[%c0_17, %c0_18] : memref<128x128xf32, #tpu.memory_space<vmem>>, vector<128x128xf32>
      %cst_19 = arith.constant dense<0.000000e+00> : vector<64x128xf32>
      %31 = tpu.matmul %26, %30, %cst_19 {dimension_numbers = #tpu.dot_dimension_numbers<[1], [0], [0], [1], [0, 0, 1, 1], [], []>} : vector<64x128xf32>, vector<128x128xf32>, vector<64x128xf32> -> vector<64x128xf32>
      %32 = arith.addf %29, %31 : vector<64x128xf32>
      %c0_20 = arith.constant 0 : index
      %c0_21 = arith.constant 0 : index
      %33 = vector.load %arg7[%c0_20, %c0_21] : memref<1x128xf32, #tpu.memory_space<vmem>>, vector<1x128xf32>
      %34 = vector.broadcast %33 : vector<1x128xf32> to vector<64x128xf32>
      %35 = arith.addf %32, %34 : vector<64x128xf32>
      %cst_22 = arith.constant 0.000000e+00 : f32
      %36 = vector.broadcast %cst_22 : f32 to vector<64x128xf32>
      %37 = arith.maximumf %35, %36 : vector<64x128xf32>
      %c0_23 = arith.constant 0 : index
      %c0_24 = arith.constant 0 : index
      %38 = vector.load %arg8[%c0_23, %c0_24] : memref<128x128xf32, #tpu.memory_space<vmem>>, vector<128x128xf32>
      %cst_25 = arith.constant dense<0.000000e+00> : vector<64x128xf32>
      %39 = tpu.matmul %37, %38, %cst_25 {dimension_numbers = #tpu.dot_dimension_numbers<[1], [0], [0], [1], [0, 0, 1, 1], [], []>} : vector<64x128xf32>, vector<128x128xf32>, vector<64x128xf32> -> vector<64x128xf32>
      %c0_26 = arith.constant 0 : index
      %c0_27 = arith.constant 0 : index
      %40 = vector.load %arg9[%c0_26, %c0_27] : memref<1x128xf32, #tpu.memory_space<vmem>>, vector<1x128xf32>
      %41 = vector.broadcast %40 : vector<1x128xf32> to vector<64x128xf32>
      %42 = arith.addf %39, %41 : vector<64x128xf32>
      %c0_28 = arith.constant 0 : index
      %c0_29 = arith.constant 0 : index
      %43 = vector.load %arg10[%c0_28, %c0_29] : memref<64x128xf32, #tpu.memory_space<vmem>>, vector<64x128xf32>
      tpu.vector_store %arg10[%c0_28, %c0_29], %42 {strides = array<i32>} : memref<64x128xf32, #tpu.memory_space<vmem>>, vector<64x128xf32>,
    } else {
    }
    return
  }
  func.func @transform_0(%arg0: i32, %arg1: i32) -> (i32, i32) {
    %c0_i32 = arith.constant 0 : i32
    %c0_i32_0 = arith.constant 0 : i32
    return %arg0, %c0_i32 : i32, i32
  }
  func.func @transform_1(%arg0: i32, %arg1: i32) -> (i32, i32) {
    %c0_i32 = arith.constant 0 : i32
    %c0_i32_0 = arith.constant 0 : i32
    return %c0_i32, %arg1 : i32, i32
  }
  func.func @transform_2(%arg0: i32, %arg1: i32) -> (i32, i32) {
    %c0_i32 = arith.constant 0 : i32
    %c0_i32_0 = arith.constant 0 : i32
    return %arg1, %c0_i32 : i32, i32
  }
  func.func @transform_3(%arg0: i32, %arg1: i32) -> (i32, i32) {
    %c0_i32 = arith.constant 0 : i32
    %c0_i32_0 = arith.constant 0 : i32
    %c0_i32_1 = arith.constant 0 : i32
    return %c0_i32, %c0_i32_0 : i32, i32
  }
  func.func @transform_4(%arg0: i32, %arg1: i32) -> (i32, i32) {
    %c0_i32 = arith.constant 0 : i32
    %c0_i32_0 = arith.constant 0 : i32
    %c0_i32_1 = arith.constant 0 : i32
    return %c0_i32, %c0_i32_0 : i32, i32
  }
  func.func @transform_5(%arg0: i32, %arg1: i32) -> (i32, i32) {
    %c0_i32 = arith.constant 0 : i32
    %c0_i32_0 = arith.constant 0 : i32
    %c0_i32_1 = arith.constant 0 : i32
    return %c0_i32, %c0_i32_0 : i32, i32
  }
  func.func @transform_6(%arg0: i32, %arg1: i32) -> (i32, i32) {
    %c0_i32 = arith.constant 0 : i32
    %c0_i32_0 = arith.constant 0 : i32
    %c0_i32_1 = arith.constant 0 : i32
    return %c0_i32, %c0_i32_0 : i32, i32
  }
  func.func @transform_7(%arg0: i32, %arg1: i32) -> (i32, i32) {
    %c0_i32 = arith.constant 0 : i32
    %c0_i32_0 = arith.constant 0 : i32
    %c0_i32_1 = arith.constant 0 : i32
    return %c0_i32, %c0_i32_0 : i32, i32
  }
  func.func @transform_8(%arg0: i32, %arg1: i32) -> (i32, i32) {
    %c0_i32 = arith.constant 0 : i32
    %c0_i32_0 = arith.constant 0 : i32
    return %arg0, %c0_i32 : i32, i32
  }
}

</mosaic_0001>

<bundles_post_ra>
// kernel: tpu_custom_call.1
= control target key start
LH: loop header
LB: loop body
LE: loop exit
PB: predicated region body
PF: predicated region fallthrough
CT: control target
= control target key end

     0   :  { %s2643_s0 = inlined_call_operand.hbm [shape: f32[128,128], index: 0, kind: input, shape index: {}]   ;;  %s2644_s1 = inlined_call_operand.hbm [shape: s32[1,384], index: 1, kind: input, shape index: {}]   ;;  %s2645_s2 = inlined_call_operand.hbm [shape: f32[384,128], index: 2, kind: input, shape index: {}]   ;;  %s2646_s3 = inlined_call_operand.hbm [shape: f32[128,128], index: 3, kind: input, shape index: {}]   ;;  %s2647_s4 = inlined_call_operand.hbm [shape: f32[128,128], index: 4, kind: input, shape index: {}]   ;;  %s2648_s5 = inlined_call_operand.vmem [shape: f32[1,128], index: 5, kind: input, shape index: {}]   ;;  %s2649_s6 = inlined_call_operand.hbm [shape: f32[128,128], index: 6, kind: input, shape index: {}]   ;;  %s2650_s7 = inlined_call_operand.vmem [shape: f32[1,128], index: 7, kind: input, shape index: {}]   ;;  %s2651_s8 = inlined_call_operand.hbm [shape: f32[128,128], index: 8, kind: output, shape index: {}]  }
   0x1   :  { %2671 = sst [smem:[#allocation29_spill]] %s2644_s1 }
   0x2   :  { %2672 = sst [smem:[#allocation30_spill]] %s2646_s3 }
   0x3   :  { %2673 = sst [smem:[#allocation31_spill]] %s2647_s4 }
   0x4   :  { %2674 = sst [smem:[#allocation32_spill]] %s2648_s5 }
   0x5   :  { %2675 = sst [smem:[#allocation33_spill]] %s2649_s6 }
   0x6   :  { %2676 = sst [smem:[#allocation34_spill]] %s2650_s7 }
   0x7   :  { %2677 = sst [smem:[#allocation35_spill]] %s2651_s8 }
   0x8   :  { %13 = vsyncpa [#allocation4], 0 }
   0x9   :  { %15 = vsyncpa [#allocation4 + $0x1], 0 }
   0xa   :  { %16 = vsyncpa [#allocation7], 0 }
   0xb   :  { %18 = vsyncpa [#allocation7 + $0x1], 0 }
   0xc   :  { %19 = vsyncpa [#allocation10], 0 }
   0xd   :  { %20 = vsyncpa [#allocation13], 0 }
   0xe   :  { %21 = vsyncpa [#allocation5], 0 }
   0xf   :  { %23 = vsyncpa [#allocation5 + $0x1], 0  ;;  %s2221_s27 = smov 0   ;;  %s2223_s28 = smov 0  }
  0x10   :  { %s2225_s29 = smov 0   ;;  %s2227_s30 = smov 0  }
  0x11   :  { %s2229_s9 = smov 0   ;;  %s2231_s10 = smov 0  }
  0x12   :  { %s2233_s11 = smov 0   ;;  %s2235_s12 = smov 0  }
  0x13   :  { %s2237_s13 = smov 0   ;;  %s2239_s14 = smov 0  }
  0x14   :  { %s2241_s15 = smov 0  }
  0x15 LB: > { %2678 = sst [smem:[#allocation20_spill]] %s2128_s29  ;;  %s2277_s16 = sadd.s32 4294967295, %s2160_s15   ;;  %s2160_s15 = sphi %s2241_s15, %s29_s15   ;;  %s2156_s14 = sphi %s2239_s14, %s2741_s14   ;;  %s2152_s13 = sphi %s2237_s13, %s2740_s13   ;;  %s2148_s12 = sphi %s2235_s12, %s2739_s12   ;;  %s2144_s11 = sphi %s2233_s11, %s2738_s11   ;;  %s2140_s10 = sphi %s2231_s10, %s2737_s10   ;;  %s2136_s9 = sphi %s2229_s9, %s2736_s9   ;;  %s2132_s30 = sphi %s2227_s30, %s2735_s30   ;;  %s2128_s29 = sphi %s2225_s29, %s2731_s29   ;;  %s2124_s28 = sphi %s2223_s28, %s2734_s28   ;;  %s2120_s27 = sphi %s2221_s27, %s2733_s27  }
  0x16   : > { %2679 = sst [smem:[#allocation21_spill]] %s2132_s30  ;;  %s1312_s17 = sadd.s32 4294967294, %s2160_s15  }
  0x17   : > { %2680 = sst [smem:[#allocation22_spill]] %s2144_s11  ;;  %p61_p0 = scmp.ne.s32.totalorder %s2136_s9, %s2132_s30 }
  0x18   : > { %2681 = sst [smem:[#allocation23_spill]] %s2148_s12  ;;  %p2654_p1 = scmp.eq.s32.totalorder %s2277_s16, 0 }
  0x19   : > { %2682 = sst [smem:[#allocation24_spill]] %s2160_s15  ;;  %p248_p2 = scmp.eq.s32.totalorder %s1312_s17, 5 }
  0x1a   : > { %p2285_p3 = por %p2654_p1, %p61_p0  ;;  %p1313_p4 = scmp.ge.s32.totalorder %s2160_s15, 1 }
  0x1b   : > { %p2290_p5 = por %p248_p2, %p61_p0  ;;  %p255_p6 = scmp.lt.s32.totalorder %s2160_s15, 7 }
  0x1c   : > { %s2683_s18 = scalar_select %p2285_p3, 1, 0 }
  0x1d   : > { %s2684_s19 = scalar_select %p2290_p5, 1, 0 }
  0x1e   : > { %p2295_p7 = pnand %p1313_p4, %p255_p6  ;;  %s2162_s21 = smov [#allocation9]  }
  0x1f   : > { %2685 = sst [smem:[#allocation25_spill]] %s2684_s19  ;;  %s267_s22 = sshll.u32 %s2162_s21, 4  ;;  %s268_s22 = int_to_ptr.vmem [resolvable:$true] %s267_s22 }
  0x20   : > { %s2686_s20 = scalar_select %p2295_p7, 1, 0 }
  0x21   : > { %p1718_p9 = pneg %p2295_p7  ;;  %s1877_s24 = scalar_lea.vmem %s268_s22, 2048 }
  0x22   : > { %p1878_p12 = scmp.ne.s32.totalorder %s268_s22, %s1877_s24  ;;  %p1885_p2 = scmp.lt.s32.totalorder %s268_s22, %s268_s22 }
  0x23   : > { %p2304_p10 = pnand %p1718_p9, %p2654_p1  ;;  %p1886_p4 = scmp.lt.s32.totalorder %s1877_s24, %s1877_s24 }
  0x25   : > { %p2653_p11 = pneg %p2304_p10  ;;  %p1887_p6 = por %p1886_p4, %p1885_p2 }
  0x27   : > { %p1880_p13 = pnand %p1878_p12, %p2653_p11 }
  0x29   : > { %p1881_p0 = pneg %p1880_p13 }
  0x2b   : > { %p1888_p8 = pnand %p1887_p6, %p1881_p0 }
  0x2d   : > { %1891 = shalt.err (!%p1888_p8)
}
  0x2e   : > { %s2655_s25 = smov 128   ;;  %s2657_s26 = smov 8  }
  0x2f   : > { %s2688_s3 = sld [smem:[#allocation30_spill]]  ;;  %s38_s24 = sadd.s32 1, %s2152_s13 }
  0x30   : > { %p2322_p8 = scmp.ge.s32.totalorder %s38_s24, 3  ;;  %p55_p9 = scmp.ne.s32.totalorder %s2140_s10, %s2136_s9 }
  0x31   : > { %p56_p12 = scmp.eq.s32.totalorder %s2160_s15, 0  ;;  %p81_p0 = scmp.ne.s32.totalorder %s2128_s29, %s2124_s28 }
  0x32   : > { %s2689_s19 = scalar_select %p2322_p8, 1, 0 }
  0x33   : > { %s2743_s24 = smov (%p2322_p8, %s38_s24), 0  ;;  %p2333_p13 = por %p56_p12, %p55_p9 }
  0x34   : > { %2690 = sst [smem:[#allocation26_spill]] %s2743_s24  ;;  %s71_s21 = ssub.s32 %s2152_s13, %s2743_s24 }
  0x35   : > { %1721 = dma.hbm_to_vmem [thread:$0]  (!%p2304_p10), %s2688_s3, 2048, %s268_s22, [#allocation10], %s2655_s25, %s2655_s25, %s2657_s26  }
  0x36   : > { %s74_s22 = sadd.s32 1, %s2128_s29  ;;  %p72_p2 = scmp.eq.s32.totalorder %s71_s21, 0 }
  0x37   : > { %p87_p4 = scmp.ne.s32.totalorder %s2124_s28, %s2120_s27  ;;  %p83_p6 = por %p81_p0, %p56_p12 }
  0x38   : > { %p2692_p11 = scmp.eq.s32.totalorder %s2277_s16, 5  ;;  %p2696_p5 = scmp.eq.s32.totalorder %s2277_s16, 0 }
  0x39   : > { %s2351_s26 = scalar_select %p72_p2, %s2128_s29, %s74_s22  }
  0x3a   : > { %p2346_p1 = por %p2692_p11, %p55_p9  ;;  %p2355_p3 = por %p87_p4, %p2696_p5 }
  0x3b   : > { %2695 = sst [smem:[#allocation28_spill]] %s2351_s26  ;;  %p1745_p7 = scmp.lt.s32.totalorder %s2160_s15, 6 }
  0x3c   : > { %s2693_s25 = scalar_select %p2346_p1, 1, 0 }
  0x3d   : > { %s334_s30 = sand.u32 1, %s2160_s15   ;;  %s336_s8 = sand.u32 1, %s2128_s29  }
  0x3e   : > { %2694 = sst [smem:[#allocation27_spill]] %s2693_s25  ;;  %p2364_p8 = pnand %p1745_p7, %p2333_p13 }
  0x3f   : > { %s1321_s27 = sshll.u32 %s2152_s13, 4  ;;  %s2699_s1 = sld [smem:[#allocation29_spill]] }
  0x40   : > { %s337_s22 = scalar_lea.vmem [#allocation6], %s336_s8  ;;  %p2372_p11 = pnand %p1745_p7, %p83_p6 }
  0x41   : > { %s344_s26 = sshll.u32 %s337_s22, 4  ;;  %s2376_s29 = sshll.u32 %s336_s8, 7  ;;  %s345_s26 = int_to_ptr.vmem [resolvable:$true] %s344_s26 }
  0x42   : > { %s2378_s17 = scalar_lea.sflag [#allocation7], %s334_s30  ;;  %p2670_p5 = pneg %p2372_p11 }
  0x43   : > { %s1905_s15 = scalar_lea.vmem %s345_s26, 16  ;;  %s2165_s7 = smov [#allocation6]  }
  0x44   : > { %p1906_p9 = scmp.ne.s32.totalorder %s345_s26, %s1905_s15  ;;  %s1910_s24 = sshll.u32 %s2165_s7, 4  ;;  %s1911_s24 = int_to_ptr.vmem [resolvable:$false] %s1910_s24 }
  0x45   : > { %s342_s25 = scalar_lea.hbm %s2699_s1, %s1321_s27  ;;  %s1912_s27 = scalar_lea.vmem %s1911_s24, 32 }
  0x46   : > { %p1908_p12 = pnand %p1906_p9, %p2670_p5  ;;  %p1913_p7 = scmp.lt.s32.totalorder %s345_s26, %s1911_s24 }
  0x47   : > { %p1914_p0 = scmp.lt.s32.totalorder %s1912_s27, %s1905_s15 }
  0x48   : > { %p1909_p13 = pneg %p1908_p12 }
  0x49   : > { %p1915_p2 = por %p1914_p0, %p1913_p7 }
  0x4b   : > { %p1916_p4 = pnand %p1915_p2, %p1909_p13 }
  0x4d   : > { %1919 = shalt.err (!%p1916_p4)
}
  0x4e   : > { %1734 = dma.hbm_to_vmem [thread:$0]  (!%p2372_p11), %s342_s25, 16, %s345_s26, %s2378_s17  }
  0x4f   : > { %s2166_s22 = smov [#allocation11]   ;;  %s2167_s7 = smov [#allocation12]  }
  0x50   : > { %s280_s1 = sshll.u32 %s2166_s22, 4  ;;  %s296_s12 = sshll.u32 %s2167_s7, 4  ;;  %s281_s1 = int_to_ptr.vmem [resolvable:$true] %s280_s1  ;;  %s297_s12 = int_to_ptr.vmem [resolvable:$true] %s296_s12 }
  0x51   : > { %s1931_s11 = scalar_lea.vmem %s281_s1, 2048  ;;  %p2701_p9 = pneg %p2304_p10 }
  0x52   : > { %p1932_p6 = scmp.ne.s32.totalorder %s281_s1, %s1931_s11  ;;  %p1939_p7 = scmp.lt.s32.totalorder %s281_s1, %s281_s1 }
  0x53   : > { %p1940_p0 = scmp.lt.s32.totalorder %s1931_s11, %s1931_s11 }
  0x54   : > { %p1934_p12 = pnand %p1932_p6, %p2701_p9 }
  0x55   : > { %p1941_p2 = por %p1940_p0, %p1939_p7 }
  0x56   : > { %p1935_p13 = pneg %p1934_p12 }
  0x58   : > { %p1942_p4 = pnand %p1941_p2, %p1935_p13 }
  0x5a   : > { %1945 = shalt.err (!%p1942_p4)
}
  0x5b   : > { %s2702_s15 = smov 8   ;;  %s2703_s25 = smov 128  }
  0x5c   : > { %s2704_s4 = sld [smem:[#allocation31_spill]]  ;;  %s1957_s27 = scalar_lea.vmem %s297_s12, 2048 }
  0x5d   : > { %p1958_p5 = scmp.ne.s32.totalorder %s297_s12, %s1957_s27  ;;  %p2705_p6 = pmov %p2701_p9 }
  0x5e   : > { %p1965_p7 = scmp.lt.s32.totalorder %s297_s12, %s297_s12  ;;  %p1966_p13 = scmp.lt.s32.totalorder %s1957_s27, %s1957_s27 }
  0x5f   : > { %p1960_p9 = pnand %p1958_p5, %p2705_p6 }
  0x60   : > { %p1967_p0 = por %p1966_p13, %p1965_p7 }
  0x61   : > { %p1961_p12 = pneg %p1960_p9 }
  0x62   : > { %1724 = dma.hbm_to_vmem [thread:$0]  (!%p2304_p10), %s2704_s4, 2048, %s281_s1, [#allocation10], %s2703_s25, %s2703_s25, %s2702_s15  }
  0x63   : > { %p1968_p2 = pnand %p1967_p0, %p1961_p12 }
  0x65   : > { %1971 = shalt.err (!%p1968_p2)
}
  0x66   : > { %s2706_s6 = sld [smem:[#allocation33_spill]]  ;;  %s313_s1 = sand.u32 1, %s2140_s10  }
  0x67   : > { %s355_s7 = scalar_lea.vmem [#allocation8], %s2376_s29  ;;  %s41_s23 = sadd.s32 1, %s2156_s14 }
  0x68   : > { %s362_s26 = sshll.u32 %s355_s7, 4  ;;  %p2707_p5 = scmp.ne.s32.totalorder %s2689_s19, 0  ;;  %s2424_s26 = int_to_ptr.vmem [resolvable:$true] %s362_s26 }
  0x69   : > { %s1318_s24 = sshll.u32 %s313_s1, 6  ;;  %s1359_s27 = sshll.u32 %s2156_s14, 10 }
  0x6a   : > { %s2745_s23 = smov (!%p2707_p5, %s41_s23), %s2156_s14  ;;  %s317_s11 = scalar_lea.vmem [#allocation3], %s1318_s24 }
  0x6b   : > { %p43_p4 = scmp.ge.s32.totalorder %s2745_s23, 2  ;;  %s324_s22 = sshll.u32 %s317_s11, 4  ;;  %s325_s22 = int_to_ptr.vmem [resolvable:$true] %s324_s22 }
  0x6c   : > { %1727 = dma.hbm_to_vmem [thread:$0]  (!%p2304_p10), %s2706_s6, 2048, %s297_s12, [#allocation13], %s2703_s25, %s2703_s25, %s2702_s15  }
  0x6d   : > { %s2747_s23 = smov (%p43_p4, %s2745_s23), 0  ;;  %s323_s12 = scalar_lea.hbm %s2643_s0, %s1359_s27 }
  0x6e   : > { %s45_s29 = ssub.s32 %s2156_s14, %s2747_s23  ;;  %s2709_s19 = sshll.u32 %s2152_s13, 11 }
  0x6f   : > { %p2428_p10 = scmp.eq.s32.totalorder %s45_s29, 0  ;;  %s2437_s24 = scalar_lea.hbm %s2645_s2, %s2709_s19 }
  0x70   : > { %s314_s11 = scalar_lea.sflag [#allocation4], %s313_s1  ;;  %p1974_p6 = pneg %p2364_p8 }
  0x71   : > { %s1985_s8 = scalar_lea.vmem %s325_s22, 1024  ;;  %s2168_s30 = smov [#allocation3]  }
  0x72   : > { %p1986_p9 = scmp.ne.s32.totalorder %s325_s22, %s1985_s8  ;;  %s1990_s27 = sshll.u32 %s2168_s30, 4  ;;  %s1991_s27 = int_to_ptr.vmem [resolvable:$false] %s1990_s27 }
  0x73   : > { %s1992_s29 = scalar_lea.vmem %s1991_s27, 2048  ;;  %p1993_p13 = scmp.lt.s32.totalorder %s325_s22, %s1991_s27 }
  0x74   : > { %p1988_p12 = pnand %p1986_p9, %p1974_p6  ;;  %p1994_p0 = scmp.lt.s32.totalorder %s1992_s29, %s1985_s8 }
  0x76   : > { %p1989_p7 = pneg %p1988_p12  ;;  %p1995_p2 = por %p1994_p0, %p1993_p13 }
  0x78   : > { %p1996_p5 = pnand %p1995_p2, %p1989_p7 }
  0x7a   : > { %1999 = shalt.err (!%p1996_p5)
}
  0x7b   : > { %1731 = dma.hbm_to_vmem [thread:$0]  (!%p2364_p8), %s323_s12, 1024, %s325_s22, %s314_s11, %s2703_s25, %s2703_s25, %s2702_s15  }
  0x7c   : > { %s2710_s4 = sadd.s32 1, %s2140_s10  ;;  %s2013_s1 = scalar_lea.vmem %s2424_s26, 2048 }
  0x7d   : > { %s2451_s6 = scalar_select %p2428_p10, %s2140_s10, %s2710_s4  }
  0x7e   : > { %p2014_p4 = scmp.ne.s32.totalorder %s2424_s26, %s2013_s1  ;;  %p2711_p6 = pneg %p2372_p11 }
  0x7f   : > { %s2169_s21 = smov [#allocation8]  }
  0x80   : > { %p2016_p9 = pnand %p2014_p4, %p2711_p6  ;;  %s2018_s19 = sshll.u32 %s2169_s21, 4  ;;  %s2019_s19 = int_to_ptr.vmem [resolvable:$false] %s2018_s19 }
  0x81   : > { %s2020_s8 = scalar_lea.vmem %s2019_s19, 4096  ;;  %p2021_p7 = scmp.lt.s32.totalorder %s2424_s26, %s2019_s19 }
  0x82   : > { %p2017_p12 = pneg %p2016_p9  ;;  %p2022_p13 = scmp.lt.s32.totalorder %s2020_s8, %s2013_s1 }
  0x84   : > { %p2023_p0 = por %p2022_p13, %p2021_p7 }
  0x86   : > { %p2024_p2 = pnand %p2023_p0, %p2017_p12 }
  0x88   : > { %2027 = shalt.err (!%p2024_p2)
}
  0x89   : > { %1737 = dma.hbm_to_vmem [thread:$0]  (!%p2372_p11), %s2437_s24, 2048, %s2424_s26, %s2378_s17, %s2703_s25, %s2703_s25, %s2702_s15  }
  0x8a   : > { %p2712_p8 = scmp.ne.s32.totalorder %s2686_s20, 0 }
  0x8b   : > { %s2470_s22 = sand.u32 (!%p2712_p8), 1, %s2136_s9   ;;  %p2713_p10 = scmp.ne.s32.totalorder (!%p2712_p8), %s2683_s18, 0 }
  0x8c   : > { %374 = sbr.rel (%p2712_p8) target bundleno = 1001 (0x3e9), region = 52  ;;  %s1326_s12 = sshll.u32 (!%p2712_p8), %s2470_s22, 6 }
  0x8d   : > { %s377_s7 = scalar_lea.sflag (!%p2712_p8), [#allocation4], %s2470_s22  ;;  %s2474_s11 = scalar_lea.vmem (!%p2712_p8), [#allocation3], %s1326_s12 }
  0x91   : > { %2099 = dma.done.wait (%p2713_p10), %s377_s7, 1024  }
  0x92   : > { %2101 = vsyncadd (%p2713_p10), %s377_s7, 4294966272  ;;  %s385_s5 = sand.u32 1, %s2277_s16   ;;  %s387_s20 = sand.u32 1, %s2124_s28  }
  0x93   : > { %s386_s17 = scalar_lea.sflag [#allocation7], %s385_s5  ;;  %s2482_s15 = scalar_lea.vmem [#allocation6], %s387_s20 }
  0x94   : > { %2103 = dma.done.wait (%p2355_p3), %s386_s17, 2064  }
  0x95   : > { %2105 = vsyncadd (%p2355_p3), %s386_s17, 4294965232  ;;  %s1327_s25 = sshll.u32 %s387_s20, 7  ;;  %p2714_p11 = scmp.eq.s32.totalorder %s2277_s16, 0 }
  0x96   : > { %s2488_s26 = scalar_lea.vmem [#allocation8], %s1327_s25 }
  0x97   : > { %2107 = dma.done.wait (%p2714_p11), [#allocation10], 4096   ;;  %p2715_p5 = pmov %p2714_p11 }
  0x99   : > { %2109 = vsyncadd (%p2715_p5), [#allocation10], 4294963200  ;;  %p2716_p4 = pmov %p2715_p5 }
  0x9b   : > { %2111 = dma.done.wait (%p2716_p4), [#allocation13], 2048   ;;  %p2717_p6 = pmov %p2716_p4 }
  0x9c   : > { %s2498_s18 = scalar_lea.vmem [#allocation14], %s1326_s12  ;;  %s2718_s24 = sld [smem:[#allocation22_spill]] }
  0x9d   : > { %2113 = vsyncadd (%p2717_p6), [#allocation13], 4294965248 }
  0xa2   : > { %p1332_p9 = scmp.ne.s32.totalorder %s2718_s24, 0 }
  0xa4   : > { %457 = sbr.rel (%p1332_p9) target bundleno = 174 (0xae), region = 80 }
  0xa9   : > { %v2170_v0 = vmov 0.0  }
  0xaa   : > { %458 = vst [vmem:[#allocation2 + $0x30] sm:$0xff] %v2170_v0  ;;  %459 = vst [vmem:[#allocation2] sm:$0xff] %v2170_v0 }
  0xab   : > { %460 = vst [vmem:[#allocation2 + $0x18] sm:$0xff] %v2170_v0  ;;  %461 = vst [vmem:[#allocation2 + $0x10] sm:$0xff] %v2170_v0 }
  0xac   : > { %462 = vst [vmem:[#allocation2 + $0x8] sm:$0xff] %v2170_v0  ;;  %463 = vst [vmem:[#allocation2 + $0x20] sm:$0xff] %v2170_v0 }
  0xad   : > { %464 = vst [vmem:[#allocation2 + $0x28] sm:$0xff] %v2170_v0  ;;  %465 = vst [vmem:[#allocation2 + $0x38] sm:$0xff] %v2170_v0 }
  0xae PF: > { %v537_v1 = vld [vmem:[%s2488_s26 + $0x78] sm:$0xff]  ;;  %v536_v2 = vld [vmem:[%s2488_s26 + $0x70] sm:$0xff]  ;;  %v535_v3 = vld [vmem:[%s2488_s26 + $0x68] sm:$0xff]  ;;  %v467_v10 = vlaneseq  ;;  %s2719_s3 = sld [smem:[#allocation23_spill]]  ;;  %v2171_v36 = vmov 1.0  }
  0xaf   : > { %1458 = vmatprep.subr.mxu0 %v537_v1  ;;  %1634 = vmatprep.subr.mxu1 %v537_v1  ;;  %v534_v4 = vld [vmem:[%s2488_s26 + $0x60] sm:$0xff]  ;;  %v533_v5 = vld [vmem:[%s2488_s26 + $0x58] sm:$0xff]  ;;  %v532_v6 = vld [vmem:[%s2488_s26 + $0x50] sm:$0xff]  ;;  %s2720_s30 = sld [smem:[#allocation22_spill]] }
  0xb0   : > { %1459 = vmatpush3.msra.mxu0 %v537_v1  ;;  %1650 = vmatpush3.msra.mxu1 %v537_v1  ;;  %v531_v7 = vld [vmem:[%s2488_s26 + $0x48] sm:$0xff]  ;;  %v530_v8 = vld [vmem:[%s2488_s26 + $0x40] sm:$0xff]  ;;  %v529_v9 = vld [vmem:[%s2488_s26 + $0x38] sm:$0xff]  ;;  %v468_v13 = vshrl.u32 %v467_v10, 7 }
  0xb1   : > { %1460 = vmatprep.subr.mxu0 %v536_v2  ;;  %1635 = vmatprep.subr.mxu1 %v536_v2  ;;  %v528_v11 = vld [vmem:[%s2488_s26 + $0x30] sm:$0xff]  ;;  %v527_v12 = vld [vmem:[%s2488_s26 + $0x28] sm:$0xff]  ;;  %v526_v14 = vld [vmem:[%s2488_s26 + $0x20] sm:$0xff] }
  0xb2   : > { %1461 = vmatpush3.msra.mxu0 %v536_v2  ;;  %1651 = vmatpush3.msra.mxu1 %v536_v2  ;;  %v525_v15 = vld [vmem:[%s2488_s26 + $0x18] sm:$0xff]  ;;  %v472_v16 = vadd.s32 32, %v468_v13  ;;  %v469_v17 = vadd.s32 8, %v468_v13  ;;  %v473_v19 = vadd.s32 40, %v468_v13  ;;  %v524_v20 = vld [vmem:[%s2488_s26 + $0x10] sm:$0xff]  ;;  %v470_v21 = vadd.s32 16, %v468_v13 }
  0xb3   : > { %1462 = vmatprep.subr.mxu0 %v535_v3  ;;  %1636 = vmatprep.subr.mxu1 %v535_v3  ;;  %v474_v22 = vadd.s32 48, %v468_v13  ;;  %v523_v23 = vld [vmem:[%s2488_s26 + $0x8] sm:$0xff]  ;;  %v1334_v27 = vld [vmem:[%s2482_s15] ss:$0 sm:$0xff]  ;;  %v471_v29 = vadd.s32 24, %v468_v13  ;;  %v475_v30 = vadd.s32 56, %v468_v13 }
  0xb4   : > { %1463 = vmatpush3.msra.mxu0 %v535_v3  ;;  %1652 = vmatpush3.msra.mxu1 %v535_v3  ;;  %s1333_s16 = sshll.u32 %s2719_s3, 6  ;;  %v522_v31 = vld [vmem:[%s2488_s26] sm:$0xff]  ;;  %v514_v41 = vld [vmem:[#allocation2 + $0x30] sm:$0xff]  ;;  %v521_v48 = vld [vmem:[#allocation2 + $0x38] sm:$0xff] }
  0xb5   : > { %1464 = vmatprep.subr.mxu0 %v534_v4  ;;  %1637 = vmatprep.subr.mxu1 %v534_v4  ;;  %v476_v18 = vstv %s1333_s16  ;;  %v515_v37 = vld [vmem:[#allocation2] sm:$0xff]  ;;  %v518_v42 = vld [vmem:[#allocation2 + $0x8] sm:$0xff]  ;;  %v517_v47 = vld [vmem:[#allocation2 + $0x10] sm:$0xff]  ;;  %p1351_p3 = scmp.ne.s32.totalorder %s2720_s30, 2 }
  0xb6   : > { %1465 = vmatpush3.msra.mxu0 %v534_v4  ;;  %1653 = vmatpush3.msra.mxu1 %v534_v4  ;;  %v477_v24 = vadd.s32 %v476_v18, %v468_v13  ;;  %v481_v25 = vadd.s32 %v476_v18, %v472_v16  ;;  %v478_v26 = vadd.s32 %v476_v18, %v469_v17  ;;  %v519_v38 = vld [vmem:[#allocation2 + $0x20] sm:$0xff]  ;;  %v516_v53 = vld [vmem:[#allocation2 + $0x18] sm:$0xff]  ;;  %v520_v54 = vld [vmem:[#allocation2 + $0x28] sm:$0xff]  ;;  %s2721_s4 = sld [smem:[#allocation32_spill]] (!%p1351_p3) }
  0xb7   : > { %1466 = vmatprep.subr.mxu0 %v533_v5  ;;  %1638 = vmatprep.subr.mxu1 %v533_v5  ;;  %v482_v28 = vadd.s32 %v476_v18, %v473_v19  ;;  %v479_v32 = vadd.s32 %v476_v18, %v470_v21  ;;  %v483_v33 = vadd.s32 %v476_v18, %v474_v22  ;;  %s2722_s19 = sld [smem:[#allocation34_spill]] (!%p1351_p3) }
  0xb8   : > { %1467 = vmatpush3.msra.mxu0 %v533_v5  ;;  %1654 = vmatpush3.msra.mxu1 %v533_v5  ;;  %vm490_vm0 = vcmp.eq.s32.totalorder %v477_v24, %v1334_v27  ;;  %vm494_vm1 = vcmp.eq.s32.totalorder %v481_v25, %v1334_v27  ;;  %vm491_vm2 = vcmp.eq.s32.totalorder %v478_v26, %v1334_v27 }
  0xb9   : > { %1468 = vmatprep.subr.mxu0 %v532_v6  ;;  %1639 = vmatprep.subr.mxu1 %v532_v6  ;;  %vm495_vm3 = vcmp.eq.s32.totalorder %v482_v28, %v1334_v27  ;;  %v480_v34 = vadd.s32 %v476_v18, %v471_v29  ;;  %v484_v35 = vadd.s32 %v476_v18, %v475_v30 }
  0xba   : > { %1469 = vmatpush3.msra.mxu0 %v532_v6  ;;  %1655 = vmatpush3.msra.mxu1 %v532_v6  ;;  %vm492_vm4 = vcmp.eq.s32.totalorder %v479_v32, %v1334_v27  ;;  %vm496_vm5 = vcmp.eq.s32.totalorder %v483_v33, %v1334_v27 }
  0xbb   : > { %1470 = vmatprep.subr.mxu0 %v531_v7  ;;  %1640 = vmatprep.subr.mxu1 %v531_v7  ;;  %vm493_vm6 = vcmp.eq.s32.totalorder %v480_v34, %v1334_v27  ;;  %vm497_vm7 = vcmp.eq.s32.totalorder %v484_v35, %v1334_v27 }
  0xbc   : > { %1471 = vmatpush3.msra.mxu0 %v531_v7  ;;  %1656 = vmatpush3.msra.mxu1 %v531_v7 }
  0xbd   : > { %1472 = vmatprep.subr.mxu0 %v530_v8  ;;  %1641 = vmatprep.subr.mxu1 %v530_v8 }
  0xbe   : > { %1473 = vmatpush3.msra.mxu0 %v530_v8  ;;  %1657 = vmatpush3.msra.mxu1 %v530_v8 }
  0xbf   : > { %1474 = vmatprep.subr.mxu0 %v529_v9  ;;  %1642 = vmatprep.subr.mxu1 %v529_v9 }
  0xc0   : > { %1475 = vmatpush3.msra.mxu0 %v529_v9  ;;  %1658 = vmatpush3.msra.mxu1 %v529_v9 }
  0xc1   : > { %1476 = vmatprep.subr.mxu0 %v528_v11  ;;  %1643 = vmatprep.subr.mxu1 %v528_v11 }
  0xc2   : > { %1477 = vmatpush3.msra.mxu0 %v528_v11  ;;  %1659 = vmatpush3.msra.mxu1 %v528_v11 }
  0xc3   : > { %1478 = vmatprep.subr.mxu0 %v527_v12  ;;  %1644 = vmatprep.subr.mxu1 %v527_v12 }
  0xc4   : > { %1479 = vmatpush3.msra.mxu0 %v527_v12  ;;  %1660 = vmatpush3.msra.mxu1 %v527_v12 }
  0xc5   : > { %1480 = vmatprep.subr.mxu0 %v526_v14  ;;  %1645 = vmatprep.subr.mxu1 %v526_v14 }
  0xc6   : > { %1481 = vmatpush3.msra.mxu0 %v526_v14  ;;  %1661 = vmatpush3.msra.mxu1 %v526_v14 }
  0xc7   : > { %1482 = vmatprep.subr.mxu0 %v525_v15  ;;  %1646 = vmatprep.subr.mxu1 %v525_v15 }
  0xc8   : > { %1483 = vmatpush3.msra.mxu0 %v525_v15  ;;  %1662 = vmatpush3.msra.mxu1 %v525_v15 }
  0xc9   : > { %1484 = vmatprep.subr.mxu0 %v524_v20  ;;  %1647 = vmatprep.subr.mxu1 %v524_v20 }
  0xca   : > { %1485 = vmatpush3.msra.mxu0 %v524_v20  ;;  %1663 = vmatpush3.msra.mxu1 %v524_v20 }
  0xcb   : > { %1486 = vmatprep.subr.mxu0 %v523_v23  ;;  %1648 = vmatprep.subr.mxu1 %v523_v23 }
  0xcc   : > { %1487 = vmatpush3.msra.mxu0 %v523_v23  ;;  %1664 = vmatpush3.msra.mxu1 %v523_v23 }
  0xcd   : > { %1488 = vmatprep.subr.mxu0 %v522_v31  ;;  %1649 = vmatprep.subr.mxu1 %v522_v31 }
  0xce   : > { %1489 = vmatpush3.msra.mxu0 %v522_v31  ;;  %1665 = vmatpush3.msra.mxu1 %v522_v31 }
  0xcf   : > { %1490 = vmatprep.mubr.msk.f32.mxu0 %vm490_vm0, %v2171_v36  ;;  %1496 = vmatprep.mubr.msk.f32.mxu1 %vm494_vm1, %v2171_v36 }
  0xd0   : > { %1491 = vmatmul.mubr.msk.f32.vlgmr.msra.gmra.mxu0 %vm491_vm2, %v2171_v36  ;;  %1497 = vmatmul.mubr.msk.f32.vlgmr.msra.gmra.mxu1 %vm495_vm3, %v2171_v36 }
  0xd1   : > { %1493 = vmatprep.mubr.msk.f32.mxu0 %vm492_vm4, %v2171_v36  ;;  %1499 = vmatprep.mubr.msk.f32.mxu1 %vm496_vm5, %v2171_v36 }
  0xd4   : > { %1494 = vmatmul.mubr.msk.f32.gmra.mxu0 %vm493_vm6, %v2171_v36  ;;  %1500 = vmatmul.mubr.msk.f32.gmra.mxu1 %vm497_vm7, %v2171_v36 }
 0x190   : > { %v1492_v39 = vpop.f32.mrf.mxu0  ;;  %v1498_v40 = vpop.f32.mrf.mxu1 }
 0x191   : > { %v644_v43 = vadd.f32 %v1492_v39, %v515_v37  ;;  %v648_v44 = vadd.f32 %v1498_v40, %v519_v38 }
 0x192   : > { %v604_v45 = vpop.f32.mrf.mxu0  ;;  %v624_v46 = vpop.f32.mrf.mxu1 }
 0x193   : > { %652 = vst [vmem:[#allocation2] sm:$0xff] %v644_v43  ;;  %656 = vst [vmem:[#allocation2 + $0x20] sm:$0xff] %v648_v44  ;;  %v643_v49 = vadd.f32 %v604_v45, %v514_v41  ;;  %v647_v50 = vadd.f32 %v624_v46, %v518_v42 }
 0x194   : > { %v1495_v51 = vpop.f32.mrf.mxu0  ;;  %v1501_v52 = vpop.f32.mrf.mxu1 }
 0x195   : > { %651 = vst [vmem:[#allocation2 + $0x30] sm:$0xff] %v643_v49  ;;  %655 = vst [vmem:[#allocation2 + $0x8] sm:$0xff] %v647_v50  ;;  %v646_v55 = vadd.f32 %v1495_v51, %v517_v47  ;;  %v650_v56 = vadd.f32 %v1501_v52, %v521_v48  ;;  %662 = sbr.rel (%p1351_p3) target bundleno = 976 (0x3d0), region = 84 }
 0x196   : > { %v614_v57 = vpop.f32.mrf.mxu0  ;;  %v634_v58 = vpop.f32.mrf.mxu1 }
 0x197   : > { %654 = vst [vmem:[#allocation2 + $0x10] sm:$0xff] %v646_v55  ;;  %658 = vst [vmem:[#allocation2 + $0x38] sm:$0xff] %v650_v56  ;;  %v645_v59 = vadd.f32 %v614_v57, %v516_v53  ;;  %v649_v60 = vadd.f32 %v634_v58, %v520_v54 }
 0x199   : > { %653 = vst [vmem:[#allocation2 + $0x18] sm:$0xff] %v645_v59  ;;  %657 = vst [vmem:[#allocation2 + $0x28] sm:$0xff] %v649_v60 }
 0x19a   : > { %v2172_v0 = vmov 16   ;;  %v2529_v4 = vld [vmem:[#allocation2] sm:$0xff]  ;;  %v757_v10 = vld [vmem:[#allocation9 + $0x70] sm:$0xff]  ;;  %v756_v12 = vld [vmem:[#allocation9 + $0x68] sm:$0xff] }
 0x19b   : > { %1849 = vset.pattern.permute.xlu1 %v2172_v0  ;;  %1848 = vset.pattern.permute.xlu0 %v2172_v0  ;;  %v672_v5 = vmax.f32 %v2529_v4, 1.0  ;;  %v2532_v6 = vld [vmem:[#allocation2 + $0x20] sm:$0xff]  ;;  %v773_v11 = vld [vmem:[#allocation11 + $0x70] sm:$0xff]  ;;  %v772_v14 = vld [vmem:[#allocation11 + $0x68] sm:$0xff] }
 0x19c   : > { %v2522_v62 = vld [vmem:[#allocation2 + $0x30] sm:$0xff]  ;;  %v2534_v7 = vld [vmem:[#allocation2 + $0x8] sm:$0xff]  ;;  %v758_v8 = vld [vmem:[#allocation9 + $0x78] sm:$0xff]  ;;  %v676_v13 = vmax.f32 %v2532_v6, 1.0 }
 0x19d   : > { %v671_v2 = vmax.f32 %v2522_v62, 1.0  ;;  %1546 = vmatprep.subr.mxu1 %v758_v8  ;;  %v774_v9 = vld [vmem:[#allocation11 + $0x78] sm:$0xff]  ;;  %v675_v15 = vmax.f32 %v2534_v7, 1.0  ;;  %v755_v17 = vld [vmem:[#allocation9 + $0x60] sm:$0xff]  ;;  %v753_v24 = vld [vmem:[#allocation9 + $0x50] sm:$0xff] }
 0x19e   : > { %v2524_v63 = vld [vmem:[#allocation2 + $0x10] sm:$0xff]  ;;  %1547 = vmatpush3.msra.mxu1 %v758_v8  ;;  %1502 = vmatprep.subr.mxu0 %v774_v9  ;;  %v2538_v16 = vld [vmem:[#allocation2 + $0x38] sm:$0xff]  ;;  %v771_v19 = vld [vmem:[#allocation11 + $0x60] sm:$0xff] }
 0x19f   : > { %v674_v3 = vmax.f32 %v2524_v63, 1.0  ;;  %1548 = vmatprep.subr.mxu1 %v757_v10  ;;  %1503 = vmatpush3.msra.mxu0 %v774_v9  ;;  %v754_v20 = vld [vmem:[#allocation9 + $0x58] sm:$0xff]  ;;  %v678_v21 = vmax.f32 %v2538_v16, 1.0  ;;  %v769_v25 = vld [vmem:[#allocation11 + $0x50] sm:$0xff]  ;;  %v752_v26 = vld [vmem:[#allocation9 + $0x48] sm:$0xff] }
 0x1a0   : > { %v2520_v61 = vld [vmem:[#allocation2 + $0x18] sm:$0xff]  ;;  %1549 = vmatpush3.msra.mxu1 %v757_v10  ;;  %1504 = vmatprep.subr.mxu0 %v773_v11  ;;  %v2540_v18 = vld [vmem:[#allocation2 + $0x28] sm:$0xff]  ;;  %v735_v53 = vld [vmem:[%s2474_s11] sm:$0xff] }
 0x1a1   : > { %v673_v1 = vmax.f32 %v2520_v61, 1.0  ;;  %1550 = vmatprep.subr.mxu1 %v756_v12  ;;  %1505 = vmatpush3.msra.mxu0 %v773_v11  ;;  %v770_v22 = vld [vmem:[#allocation11 + $0x58] sm:$0xff]  ;;  %v677_v23 = vmax.f32 %v2540_v18, 1.0  ;;  %v768_v27 = vld [vmem:[#allocation11 + $0x48] sm:$0xff]  ;;  %v751_v28 = vld [vmem:[#allocation9 + $0x40] sm:$0xff] }
 0x1a2   : > { %1551 = vmatpush3.msra.mxu1 %v756_v12  ;;  %1506 = vmatprep.subr.mxu0 %v772_v14  ;;  %v767_v30 = vld [vmem:[#allocation11 + $0x40] sm:$0xff]  ;;  %v750_v32 = vld [vmem:[#allocation9 + $0x38] sm:$0xff]  ;;  %v749_v36 = vld [vmem:[#allocation9 + $0x30] sm:$0xff] }
 0x1a3   : > { %1850 = vrcp.f32 %v673_v1  ;;  %1552 = vmatprep.subr.mxu1 %v755_v17  ;;  %1507 = vmatpush3.msra.mxu0 %v772_v14  ;;  %v766_v35 = vld [vmem:[#allocation11 + $0x38] sm:$0xff]  ;;  %v765_v37 = vld [vmem:[#allocation11 + $0x30] sm:$0xff]  ;;  %v748_v39 = vld [vmem:[#allocation9 + $0x28] sm:$0xff] }
 0x1a4   : > { %1852 = vrcp.f32 %v671_v2  ;;  %1553 = vmatpush3.msra.mxu1 %v755_v17  ;;  %1508 = vmatprep.subr.mxu0 %v771_v19  ;;  %v764_v41 = vld [vmem:[#allocation11 + $0x28] sm:$0xff]  ;;  %v747_v42 = vld [vmem:[#allocation9 + $0x20] sm:$0xff]  ;;  %v746_v46 = vld [vmem:[#allocation9 + $0x18] sm:$0xff] }
 0x1a5   : > { %1854 = vrcp.f32 %v674_v3  ;;  %1554 = vmatprep.subr.mxu1 %v754_v20  ;;  %1509 = vmatpush3.msra.mxu0 %v771_v19  ;;  %v763_v45 = vld [vmem:[#allocation11 + $0x20] sm:$0xff]  ;;  %v762_v47 = vld [vmem:[#allocation11 + $0x18] sm:$0xff]  ;;  %v745_v48 = vld [vmem:[#allocation9 + $0x10] sm:$0xff] }
 0x1a6   : > { %1856 = vrcp.f32 %v672_v5  ;;  %1555 = vmatpush3.msra.mxu1 %v754_v20  ;;  %1510 = vmatprep.subr.mxu0 %v770_v22  ;;  %v761_v49 = vld [vmem:[#allocation11 + $0x10] sm:$0xff]  ;;  %v744_v50 = vld [vmem:[#allocation9 + $0x8] sm:$0xff]  ;;  %v743_v52 = vld [vmem:[#allocation9] sm:$0xff] }
 0x1a7   : > { %1858 = vrcp.f32 %v676_v13  ;;  %1556 = vmatprep.subr.mxu1 %v753_v24  ;;  %1511 = vmatpush3.msra.mxu0 %v770_v22  ;;  %v760_v51 = vld [vmem:[#allocation11 + $0x8] sm:$0xff]  ;;  %v759_v54 = vld [vmem:[#allocation11] sm:$0xff]  ;;  %v1023_v57 = vld [vmem:[#allocation12 + $0x78] sm:$0xff] }
 0x1a8   : > { %1860 = vrcp.f32 %v675_v15  ;;  %1557 = vmatpush3.msra.mxu1 %v753_v24  ;;  %1512 = vmatprep.subr.mxu0 %v769_v25  ;;  %v736_v55 = vld [vmem:[%s2474_s11 + $0x8] sm:$0xff]  ;;  %v737_v56 = vld [vmem:[%s2474_s11 + $0x10] sm:$0xff]  ;;  %v738_v58 = vld [vmem:[%s2474_s11 + $0x18] sm:$0xff] }
 0x1a9   : > { %1862 = vrcp.f32 %v678_v21  ;;  %1558 = vmatprep.subr.mxu1 %v752_v26  ;;  %1513 = vmatpush3.msra.mxu0 %v769_v25  ;;  %v739_v59 = vld [vmem:[%s2474_s11 + $0x20] sm:$0xff]  ;;  %v1022_v60 = vld [vmem:[#allocation12 + $0x70] sm:$0xff]  ;;  %v740_v0 = vld [vmem:[%s2474_s11 + $0x28] sm:$0xff] }
 0x1aa   : > { %1864 = vrcp.f32 %v677_v23  ;;  %1559 = vmatpush3.msra.mxu1 %v752_v26  ;;  %1514 = vmatprep.subr.mxu0 %v768_v27  ;;  %v1021_v1 = vld [vmem:[#allocation12 + $0x68] sm:$0xff]  ;;  %v1020_v3 = vld [vmem:[#allocation12 + $0x60] sm:$0xff]  ;;  %v742_v5 = vld [vmem:[%s2474_s11 + $0x38] sm:$0xff] }
 0x1ab   : > { %1560 = vmatprep.subr.mxu1 %v751_v28  ;;  %1515 = vmatpush3.msra.mxu0 %v768_v27  ;;  %v741_v2 = vld [vmem:[%s2474_s11 + $0x30] sm:$0xff]  ;;  %v1019_v8 = vld [vmem:[#allocation12 + $0x58] sm:$0xff]  ;;  %v1016_v11 = vld [vmem:[#allocation12 + $0x40] sm:$0xff] }
 0x1ac   : > { %1561 = vmatpush3.msra.mxu1 %v751_v28  ;;  %1516 = vmatprep.subr.mxu0 %v767_v30  ;;  %v1018_v9 = vld [vmem:[#allocation12 + $0x50] sm:$0xff]  ;;  %v1017_v10 = vld [vmem:[#allocation12 + $0x48] sm:$0xff]  ;;  %v1015_v12 = vld [vmem:[#allocation12 + $0x38] sm:$0xff] }
 0x1ad   : > { %1562 = vmatprep.subr.mxu1 %v750_v32  ;;  %1517 = vmatpush3.msra.mxu0 %v767_v30  ;;  %v1014_v13 = vld [vmem:[#allocation12 + $0x30] sm:$0xff]  ;;  %v1013_v14 = vld [vmem:[#allocation12 + $0x28] sm:$0xff] }
 0x1ae   : > { %1563 = vmatpush3.msra.mxu1 %v750_v32  ;;  %1518 = vmatprep.subr.mxu0 %v766_v35 }
 0x1af   : > { %1564 = vmatprep.subr.mxu1 %v749_v36  ;;  %1519 = vmatpush3.msra.mxu0 %v766_v35 }
 0x1b0   : > { %v1851_v29 = vpop.eup %1850  ;;  %1565 = vmatpush3.msra.mxu1 %v749_v36  ;;  %1520 = vmatprep.subr.mxu0 %v765_v37  ;;  %v1352_v36 = vld [vmem:[%s2721_s4] ss:$0 sm:$0xff] }
 0x1b1   : > { %v1853_v31 = vpop.eup %1852  ;;  %699 = vperm.xlu1 %1849, %v1851_v29   ;;  %1566 = vmatprep.subr.mxu1 %v748_v39  ;;  %v1008_v29 = vld [vmem:[#allocation12] sm:$0xff] }
 0x1b2   : > { %v1855_v33 = vpop.eup %1854  ;;  %689 = vperm.xlu0 %1848, %v1853_v31   ;;  %1521 = vmatpush3.msra.mxu0 %v765_v37 }
 0x1b3   : > { %v1857_v34 = vpop.eup %1856  ;;  %1567 = vmatpush3.msra.mxu1 %v748_v39  ;;  %1522 = vmatprep.subr.mxu0 %v764_v41 }
 0x1b4   : > { %v1859_v38 = vpop.eup %1858  ;;  %1568 = vmatprep.subr.mxu1 %v747_v42  ;;  %1523 = vmatpush3.msra.mxu0 %v764_v41 }
 0x1b5   : > { %704 = vperm.xlu1 %1849, %v1855_v33   ;;  %v1861_v40 = vpop.eup %1860  ;;  %1569 = vmatpush3.msra.mxu1 %v747_v42 }
 0x1b6   : > { %694 = vperm.xlu0 %1848, %v1857_v34   ;;  %v1863_v43 = vpop.eup %1862  ;;  %1524 = vmatprep.subr.mxu0 %v763_v45 }
 0x1b7   : > { %v1865_v44 = vpop.eup %1864  ;;  %1570 = vmatprep.subr.mxu1 %v746_v46  ;;  %1525 = vmatpush3.msra.mxu0 %v763_v45 }
 0x1b8   : > { %1571 = vmatpush3.msra.mxu1 %v746_v46  ;;  %1526 = vmatprep.subr.mxu0 %v762_v47 }
 0x1b9   : > { %714 = vperm.xlu1 %1849, %v1859_v38   ;;  %1572 = vmatprep.subr.mxu1 %v745_v48 }
 0x1ba   : > { %709 = vperm.xlu0 %1848, %v1861_v40   ;;  %1527 = vmatpush3.msra.mxu0 %v762_v47 }
 0x1bb   : > { %1573 = vmatpush3.msra.mxu1 %v745_v48  ;;  %1528 = vmatprep.subr.mxu0 %v761_v49 }
 0x1bc   : > { %1574 = vmatprep.subr.mxu1 %v744_v50  ;;  %1529 = vmatpush3.msra.mxu0 %v761_v49 }
 0x1bd   : > { %724 = vperm.xlu1 %1849, %v1863_v43   ;;  %1575 = vmatpush3.msra.mxu1 %v744_v50 }
 0x1be   : > { %719 = vperm.xlu0 %1848, %v1865_v44   ;;  %1530 = vmatprep.subr.mxu0 %v760_v51 }
 0x1bf   : > { %1576 = vmatprep.subr.mxu1 %v743_v52  ;;  %1531 = vmatpush3.msra.mxu0 %v760_v51 }
 0x1c0   : > { %1577 = vmatpush3.msra.mxu1 %v743_v52  ;;  %1578 = vmatprep.mubr.f32.mxu1 %v735_v53 }
 0x1c1   : > { %1532 = vmatprep.subr.mxu0 %v759_v54  ;;  %1579 = vmatmul.mubr.f32.vlgmr.msra.gmra.mxu1 %v736_v55 }
 0x1c2   : > { %1533 = vmatpush3.msra.mxu0 %v759_v54  ;;  %1581 = vmatprep.mubr.f32.mxu1 %v737_v56 }
 0x1c3   : > { %1590 = vmatprep.subr.mxu0 %v1023_v57  ;;  %1666 = vmatprep.subr.mxu1 %v1023_v57 }
 0x1c4   : > { %1682 = vmatpush3.msra.mxu1 %v1023_v57 }
 0x1c5   : > { %1582 = vmatmul.mubr.f32.gmra.mxu1 %v738_v58  ;;  %1667 = vmatprep.subr.mxu1 %v1022_v60 }
 0x1c6   : > { %1584 = vmatprep.mubr.f32.mxu1 %v739_v59  ;;  %1683 = vmatpush3.msra.mxu1 %v1022_v60 }
 0x1c7   : > { %1668 = vmatprep.subr.mxu1 %v1021_v1 }
 0x1c8   : > { %1684 = vmatpush3.msra.mxu1 %v1021_v1 }
 0x1c9   : > { %1585 = vmatmul.mubr.f32.gmra.mxu1 %v740_v0  ;;  %1669 = vmatprep.subr.mxu1 %v1020_v3 }
 0x1ca   : > { %1587 = vmatprep.mubr.f32.mxu1 %v741_v2  ;;  %1685 = vmatpush3.msra.mxu1 %v1020_v3 }
 0x1cb   : > { %1670 = vmatprep.subr.mxu1 %v1019_v8 }
 0x1cc   : > { %1686 = vmatpush3.msra.mxu1 %v1019_v8 }
 0x1cd   : > { %1588 = vmatmul.mubr.f32.gmra.mxu1 %v742_v5  ;;  %1671 = vmatprep.subr.mxu1 %v1018_v9 }
 0x1ce   : > { %1687 = vmatpush3.msra.mxu1 %v1018_v9 }
 0x1cf   : > { %1672 = vmatprep.subr.mxu1 %v1017_v10 }
 0x1d0   : > { %1688 = vmatpush3.msra.mxu1 %v1017_v10 }
 0x1d1   : > { %1673 = vmatprep.subr.mxu1 %v1016_v11 }
 0x1d2   : > { %1689 = vmatpush3.msra.mxu1 %v1016_v11 }
 0x1d3   : > { %1674 = vmatprep.subr.mxu1 %v1015_v12 }
 0x1d4   : > { %1690 = vmatpush3.msra.mxu1 %v1015_v12 }
 0x1d5   : > { %1675 = vmatprep.subr.mxu1 %v1014_v13 }
 0x1d6   : > { %1691 = vmatpush3.msra.mxu1 %v1014_v13 }
 0x1d7   : > { %1676 = vmatprep.subr.mxu1 %v1013_v14 }
 0x1d8   : > { %1692 = vmatpush3.msra.mxu1 %v1013_v14 }
 0x22c   : > { %v700_v15 = vpop.permute.xlu1 %699 }
 0x22d   : > { %v690_v17 = vpop.permute.xlu0 %689  ;;  %v729_v21 = vmul.f32 %v700_v15, %v2520_v61 }
 0x22e   : > { %v727_v19 = vmul.f32 %v690_v17, %v2522_v62 }
 0x230   : > { %1534 = vmatprep.mubr.f32.mxu0 %v727_v19  ;;  %v705_v20 = vpop.permute.xlu1 %704 }
 0x231   : > { %v695_v22 = vpop.permute.xlu0 %694  ;;  %v730_v26 = vmul.f32 %v705_v20, %v2524_v63 }
 0x232   : > { %v728_v23 = vmul.f32 %v695_v22, %v2529_v4 }
 0x234   : > { %1535 = vmatmul.mubr.f32.vlgmr.msra.gmra.mxu0 %v728_v23  ;;  %v715_v24 = vpop.permute.xlu1 %714 }
 0x235   : > { %1537 = vmatprep.mubr.f32.mxu0 %v729_v21  ;;  %v710_v25 = vpop.permute.xlu0 %709  ;;  %1591 = vmatpush3.msra.mxu0 %v1023_v57  ;;  %v732_v61 = vmul.f32 %v715_v24, %v2532_v6  ;;  %v1012_v6 = vld [vmem:[#allocation12 + $0x20] sm:$0xff] }
 0x236   : > { %v731_v27 = vmul.f32 %v710_v25, %v2534_v7  ;;  %1592 = vmatprep.subr.mxu0 %v1022_v60  ;;  %1677 = vmatprep.subr.mxu1 %v1012_v6  ;;  %v1011_v7 = vld [vmem:[#allocation12 + $0x18] sm:$0xff] }
 0x237   : > { %1593 = vmatpush3.msra.mxu0 %v1022_v60  ;;  %1693 = vmatpush3.msra.mxu1 %v1012_v6 }
 0x238   : > { %1538 = vmatmul.mubr.f32.gmra.mxu0 %v730_v26  ;;  %1594 = vmatprep.subr.mxu0 %v1021_v1  ;;  %v725_v28 = vpop.permute.xlu1 %724 }
 0x239   : > { %1540 = vmatprep.mubr.f32.mxu0 %v731_v27  ;;  %v720_v62 = vpop.permute.xlu0 %719  ;;  %1595 = vmatpush3.msra.mxu0 %v1021_v1  ;;  %v734_v63 = vmul.f32 %v725_v28, %v2538_v16  ;;  %v1010_v16 = vld [vmem:[#allocation12 + $0x10] sm:$0xff] }
 0x23a   : > { %v733_v4 = vmul.f32 %v720_v62, %v2540_v18  ;;  %1596 = vmatprep.subr.mxu0 %v1020_v3  ;;  %1678 = vmatprep.subr.mxu1 %v1011_v7  ;;  %v1009_v18 = vld [vmem:[#allocation12 + $0x8] sm:$0xff] }
 0x23b   : > { %1597 = vmatpush3.msra.mxu0 %v1020_v3  ;;  %1694 = vmatpush3.msra.mxu1 %v1011_v7 }
 0x23c   : > { %1541 = vmatmul.mubr.f32.gmra.mxu0 %v732_v61  ;;  %1598 = vmatprep.subr.mxu0 %v1019_v8 }
 0x23d   : > { %1543 = vmatprep.mubr.f32.mxu0 %v733_v4  ;;  %1599 = vmatpush3.msra.mxu0 %v1019_v8 }
 0x23e   : > { %1600 = vmatprep.subr.mxu0 %v1018_v9  ;;  %1679 = vmatprep.subr.mxu1 %v1010_v16 }
 0x23f   : > { %1601 = vmatpush3.msra.mxu0 %v1018_v9  ;;  %1695 = vmatpush3.msra.mxu1 %v1010_v16 }
 0x240   : > { %1544 = vmatmul.mubr.f32.gmra.mxu0 %v734_v63  ;;  %1602 = vmatprep.subr.mxu0 %v1017_v10 }
 0x241   : > { %1603 = vmatpush3.msra.mxu0 %v1017_v10  ;;  %1680 = vmatprep.subr.mxu1 %v1009_v18 }
 0x242   : > { %1604 = vmatprep.subr.mxu0 %v1016_v11  ;;  %1696 = vmatpush3.msra.mxu1 %v1009_v18 }
 0x243   : > { %1605 = vmatpush3.msra.mxu0 %v1016_v11  ;;  %1681 = vmatprep.subr.mxu1 %v1008_v29 }
 0x244   : > { %1606 = vmatprep.subr.mxu0 %v1015_v12  ;;  %1697 = vmatpush3.msra.mxu1 %v1008_v29 }
 0x245   : > { %1607 = vmatpush3.msra.mxu0 %v1015_v12 }
 0x246   : > { %1608 = vmatprep.subr.mxu0 %v1014_v13 }
 0x247   : > { %1609 = vmatpush3.msra.mxu0 %v1014_v13  ;;  %v1353_v13 = vld [vmem:[%s2722_s19] ss:$0 sm:$0xff] }
 0x248   : > { %1610 = vmatprep.subr.mxu0 %v1013_v14 }
 0x249   : > { %1611 = vmatpush3.msra.mxu0 %v1013_v14 }
 0x24a   : > { %1612 = vmatprep.subr.mxu0 %v1012_v6 }
 0x24b   : > { %1613 = vmatpush3.msra.mxu0 %v1012_v6 }
 0x24c   : > { %1614 = vmatprep.subr.mxu0 %v1011_v7 }
 0x24d   : > { %1615 = vmatpush3.msra.mxu0 %v1011_v7 }
 0x24e   : > { %1616 = vmatprep.subr.mxu0 %v1010_v16 }
 0x24f   : > { %1617 = vmatpush3.msra.mxu0 %v1010_v16 }
 0x250   : > { %1618 = vmatprep.subr.mxu0 %v1009_v18 }
 0x251   : > { %1619 = vmatpush3.msra.mxu0 %v1009_v18 }
 0x252   : > { %1620 = vmatprep.subr.mxu0 %v1008_v29 }
 0x253   : > { %1621 = vmatpush3.msra.mxu0 %v1008_v29 }
 0x281   : > { %v1580_v30 = vpop.f32.mrf.mxu1 }
 0x283   : > { %v946_v31 = vpop.f32.mrf.mxu1 }
 0x285   : > { %v1583_v32 = vpop.f32.mrf.mxu1 }
 0x287   : > { %v956_v33 = vpop.f32.mrf.mxu1 }
 0x289   : > { %v1586_v38 = vpop.f32.mrf.mxu1 }
 0x28b   : > { %v966_v45 = vpop.f32.mrf.mxu1 }
 0x28d   : > { %v1589_v54 = vpop.f32.mrf.mxu1 }
 0x28f   : > { %v976_v1 = vpop.f32.mrf.mxu1 }
 0x2f4   : > { %v1536_v34 = vpop.f32.mrf.mxu0 }
 0x2f5   : > { %v952_v35 = vadd.f32 %v1580_v30, %v1536_v34 }
 0x2f6   : > { %v841_v37 = vpop.f32.mrf.mxu0 }
 0x2f7   : > { %v947_v39 = vadd.f32 %v946_v31, %v841_v37  ;;  %v993_v40 = vadd.f32 %v1352_v36, %v952_v35 }
 0x2f8   : > { %v1539_v41 = vpop.f32.mrf.mxu0 }
 0x2f9   : > { %v992_v42 = vadd.f32 %v1352_v36, %v947_v39  ;;  %v962_v43 = vadd.f32 %v1583_v32, %v1539_v41  ;;  %v1001_v48 = vmax.f32 %v993_v40, 0.0 }
 0x2fa   : > { %v851_v44 = vpop.f32.mrf.mxu0 }
 0x2fb   : > { %v1000_v46 = vmax.f32 %v992_v42, 0.0  ;;  %v957_v47 = vadd.f32 %v956_v33, %v851_v44  ;;  %v995_v49 = vadd.f32 %v1352_v36, %v962_v43 }
 0x2fc   : > { %v1542_v50 = vpop.f32.mrf.mxu0 }
 0x2fd   : > { %v994_v51 = vadd.f32 %v1352_v36, %v957_v47  ;;  %v972_v52 = vadd.f32 %v1586_v38, %v1542_v50  ;;  %1622 = vmatprep.mubr.f32.mxu0 %v1000_v46  ;;  %v1003_v57 = vmax.f32 %v995_v49, 0.0 }
 0x2fe   : > { %v861_v53 = vpop.f32.mrf.mxu0  ;;  %1623 = vmatmul.mubr.f32.vlgmr.msra.gmra.mxu0 %v1001_v48 }
 0x2ff   : > { %v1002_v55 = vmax.f32 %v994_v51, 0.0  ;;  %v967_v56 = vadd.f32 %v966_v45, %v861_v53  ;;  %v997_v58 = vadd.f32 %v1352_v36, %v972_v52 }
 0x300   : > { %v1545_v59 = vpop.f32.mrf.mxu0 }
 0x301   : > { %v996_v60 = vadd.f32 %v1352_v36, %v967_v56  ;;  %v982_v0 = vadd.f32 %v1589_v54, %v1545_v59  ;;  %1625 = vmatprep.mubr.f32.mxu0 %v1002_v55  ;;  %v1005_v8 = vmax.f32 %v997_v58, 0.0 }
 0x302   : > { %v871_v2 = vpop.f32.mrf.mxu0  ;;  %1626 = vmatmul.mubr.f32.gmra.mxu0 %v1003_v57 }
 0x303   : > { %v1004_v3 = vmax.f32 %v996_v60, 0.0  ;;  %v977_v5 = vadd.f32 %v976_v1, %v871_v2  ;;  %v999_v9 = vadd.f32 %v1352_v36, %v982_v0 }
 0x305   : > { %v998_v10 = vadd.f32 %v1352_v36, %v977_v5  ;;  %1628 = vmatprep.mubr.f32.mxu1 %v1004_v3  ;;  %v1007_v12 = vmax.f32 %v999_v9, 0.0 }
 0x306   : > { %1629 = vmatmul.mubr.f32.vlgmr.msra.gmra.mxu1 %v1005_v8 }
 0x307   : > { %v1006_v11 = vmax.f32 %v998_v10, 0.0 }
 0x309   : > { %1631 = vmatprep.mubr.f32.mxu1 %v1006_v11 }
 0x30a   : > { %1632 = vmatmul.mubr.f32.gmra.mxu1 %v1007_v12 }
 0x3be   : > { %v1624_v14 = vpop.f32.mrf.mxu0 }
 0x3bf   : > { %v1103_v15 = vadd.f32 %v1624_v14, %v1353_v13 }
 0x3c0   : > { %v1097_v17 = vpop.f32.mrf.mxu0 }
 0x3c1   : > { %1137 = vst [vmem:[%s2498_s18 + $0x8] sm:$0xff] %v1103_v15  ;;  %v1098_v19 = vadd.f32 %v1353_v13, %v1097_v17 }
 0x3c2   : > { %v1627_v20 = vpop.f32.mrf.mxu0 }
 0x3c3   : > { %1136 = vst [vmem:[%s2498_s18] sm:$0xff] %v1098_v19  ;;  %v1113_v21 = vadd.f32 %v1627_v20, %v1353_v13 }
 0x3c4   : > { %v1107_v22 = vpop.f32.mrf.mxu0 }
 0x3c5   : > { %1139 = vst [vmem:[%s2498_s18 + $0x18] sm:$0xff] %v1113_v21  ;;  %v1108_v23 = vadd.f32 %v1353_v13, %v1107_v22 }
 0x3c6   : > { %v1630_v24 = vpop.f32.mrf.mxu1 }
 0x3c7   : > { %1138 = vst [vmem:[%s2498_s18 + $0x10] sm:$0xff] %v1108_v23  ;;  %v1123_v25 = vadd.f32 %v1630_v24, %v1353_v13 }
 0x3c8   : > { %v1117_v26 = vpop.f32.mrf.mxu1 }
 0x3c9   : > { %1141 = vst [vmem:[%s2498_s18 + $0x28] sm:$0xff] %v1123_v25  ;;  %v1118_v27 = vadd.f32 %v1353_v13, %v1117_v26 }
 0x3ca   : > { %v1633_v62 = vpop.f32.mrf.mxu1 }
 0x3cb   : > { %1140 = vst [vmem:[%s2498_s18 + $0x20] sm:$0xff] %v1118_v27  ;;  %v1133_v61 = vadd.f32 %v1633_v62, %v1353_v13 }
 0x3cc   : > { %v1127_v4 = vpop.f32.mrf.mxu1 }
 0x3cd   : > { %1143 = vst [vmem:[%s2498_s18 + $0x38] sm:$0xff] %v1133_v61  ;;  %v1128_v28 = vadd.f32 %v1353_v13, %v1127_v4 }
 0x3cf   : > { %1142 = vst [vmem:[%s2498_s18 + $0x30] sm:$0xff] %v1128_v28 }
 0x3d0 PF: > { %s2723_s8 = sld [smem:[#allocation23_spill]]  ;;  %s1158_s15 = sshll.u32 %s2498_s18, 4  ;;  %s2581_s15 = int_to_ptr.vmem [resolvable:$true] %s1158_s15 }
 0x3d1   : > { %s2725_s20 = sld [smem:[#allocation35_spill]]  ;;  %s1145_s25 = scalar_lea.sflag [#allocation5], %s2470_s22 }
 0x3d2   : > { %s2028_s26 = scalar_lea.vmem %s2581_s15, 1024  ;;  %s2173_s24 = smov [#allocation14]  }
 0x3d3   : > { %p2029_p12 = scmp.ne.s32.totalorder %s2581_s15, %s2028_s26  ;;  %s2032_s3 = sshll.u32 %s2173_s24, 4  ;;  %s2033_s3 = int_to_ptr.vmem [resolvable:$false] %s2032_s3 }
 0x3d4   : > { %s2034_s16 = scalar_lea.vmem %s2033_s3, 2048  ;;  %p2035_p0 = scmp.lt.s32.totalorder %s2581_s15, %s2033_s3 }
 0x3d5   : > { %p2030_p7 = pnand %p2029_p12, %p2346_p1  ;;  %p2036_p2 = scmp.lt.s32.totalorder %s2034_s16, %s2028_s26 }
 0x3d6   : > { %s1361_s7 = sshll.u32 %s2723_s8, 10 }
 0x3d7   : > { %s2578_s17 = scalar_lea.hbm %s2725_s20, %s1361_s7  ;;  %p2031_p13 = pneg %p2030_p7 }
 0x3d8   : > { %p2037_p8 = por %p2036_p2, %p2035_p0 }
 0x3da   : > { %p2038_p10 = pnand %p2037_p8, %p2031_p13 }
 0x3dc   : > { %2041 = shalt.err (!%p2038_p10)
}
 0x3dd   : > { %s2042_s18 = scalar_lea.hbm %s2578_s17, 1024  ;;  %s2046_s29 = scalar_lea.hbm %s2725_s20, 2048 }
 0x3de   : > { %p2043_p11 = scmp.ne.s32.totalorder %s2578_s17, %s2042_s18  ;;  %p2047_p6 = scmp.lt.s32.totalorder %s2578_s17, %s2725_s20 }
 0x3df   : > { %p2048_p9 = scmp.lt.s32.totalorder %s2046_s29, %s2042_s18 }
 0x3e0   : > { %p2044_p5 = pnand %p2043_p11, %p2346_p1 }
 0x3e1   : > { %p2049_p3 = por %p2048_p9, %p2047_p6 }
 0x3e2   : > { %p2045_p4 = pneg %p2044_p5 }
 0x3e4   : > { %p2050_p12 = pnand %p2049_p3, %p2045_p4 }
 0x3e6   : > { %2053 = shalt.err (!%p2050_p12)
}
 0x3e7   : > { %s2174_s21 = smov 128   ;;  %s2175_s19 = smov 8  }
 0x3e8   : > { %1716 = dma.vmem_to_hbm [thread:$0]  (%p2346_p1), %s2581_s15, 1024, %s2578_s17, %s1145_s25, %s2174_s21, %s2174_s21, %s2175_s19  }
 0x3e9 PF: > { %s2726_s8 = sld [smem:[#allocation24_spill]] }
 0x3ea   : > { %s2727_s7 = sld [smem:[#allocation21_spill]] }
 0x3eb   : > { %s2728_s11 = sld [smem:[#allocation25_spill]] }
 0x3ef   : > { %p1749_p7 = scmp.ge.s32.totalorder %s2726_s8, 2 }
 0x3f0   : > { %s1173_s5 = sand.u32 1, %s2727_s7  }
 0x3f1   : > { %p2729_p13 = scmp.ne.s32.totalorder %s2728_s11, 0  ;;  %s1174_s26 = scalar_lea.sflag [#allocation5], %s1173_s5 }
 0x3f3   : > { %p1739_p0 = pnand %p1749_p7, %p2729_p13 }
 0x3f5   : > { %p1740_p2 = pneg %p1739_p0 }
 0x3f7   : > { %2115 = dma.done.wait (%p1740_p2), %s1174_s26, 1024  }
 0x3f8   : > { %2117 = vsyncadd (%p1740_p2), %s1174_s26, 4294966272  ;;  %s29_s15 = sadd.s32 1, %s2726_s8   ;;  %s2730_s24 = sld [smem:[#allocation20_spill]] }
 0x3f9   : > { %p26_p8 = scmp.ge.s32.totalorder %s29_s15, 8   ;;  %s2731_s29 = sld [smem:[#allocation28_spill]] }
 0x3fa   : > { %s2732_s22 = sld [smem:[#allocation26_spill]]  ;;  %s2733_s27 = smov %s2124_s28 }
 0x3fb   : > { %s2735_s30 = smov %s2136_s9  ;;  %s2736_s9 = smov %s2140_s10 }
 0x3fc   : > { %s2737_s10 = smov %s2451_s6  ;;  %s2738_s11 = smov %s2152_s13 }
 0x3fd   : > { %s2739_s12 = smov %s2156_s14  ;;  %s2741_s14 = smov %s2747_s23 }
 0x3fe   : > { %s2734_s28 = smov %s2730_s24  ;;  %28 = sbr.rel (!%p26_p8) target bundleno = 21 (0x15), region = 141 }
 0x400   : > { %s2740_s13 = smov %s2732_s22 }
 0x403   :  { %1179 = vsyncpa [#allocation4], 1 }
 0x404   :  { %1181 = vsyncpa [#allocation4 + $0x1], 1 }
 0x405   :  { %1182 = vsyncpa [#allocation7], 1 }
 0x406   :  { %1184 = vsyncpa [#allocation7 + $0x1], 1 }
 0x407   :  { %1185 = vsyncpa [#allocation10], 1 }
 0x408   :  { %1186 = vsyncpa [#allocation13], 1 }
 0x409   :  { %1187 = vsyncpa [#allocation5], 1 }
 0x40a   :  { %1189 = vsyncpa [#allocation5 + $0x1], 1 }

</bundles_post_ra>
